<compile_context>
chip_gen: v7x
topology: tpu7x:2x2x1
jax: 0.10.0
libtpu: 0.0.40
codegen_flags: <defaults>
</compile_context>

<pallas_src>
import functools

import jax
import jax.numpy as jnp
from jax import lax
from jax.experimental import pallas as pl
from jax.experimental.pallas import tpu as pltpu

LANE = 128


def _round_up(x, m):
    return (x + m - 1) // m * m


def _num_tensorcores():
    """How many TensorCores a single Pallas grid can shard across."""
    try:
        kind = jax.devices()[0].device_kind.lower()
    except Exception:  # pragma: no cover - defensive
        return 1
    for tag in ("v4", "v5p", "7"):  # megacore (v4/v5p) and v7x (2 TC/chip)
        if tag in kind:
            return 2
    return 1


def _nmse_kernel(yp_ref, yt_ref, out_ref, *, chunk):
    """Accumulate sum((yp - yt)^2) per lane into the resident (8, W) out block."""
    k = pl.program_id(1)

    @pl.when(k == 0)
    def _():
        out_ref[...] = jnp.zeros_like(out_ref)

    tm, w = yp_ref.shape
    nchunks = tm // chunk

    def body(j, acc):
        i = pl.multiple_of(j * chunk, chunk)
        a = yp_ref[pl.ds(i, chunk), :].astype(jnp.float32)
        b = yt_ref[pl.ds(i, chunk), :].astype(jnp.float32)
        d = a - b
        return acc + d * d

    acc = lax.fori_loop(
        0, nchunks, body,
        jnp.zeros((chunk, w), jnp.float32),
        unroll=min(8, nchunks),
    )

    # Fold (chunk, W) down to the vreg-shaped (8, W) output block (only does
    # work for packed narrow dtypes where chunk > 8).
    folded = acc[0:8, :]
    for off in range(8, chunk, 8):
        folded = folded + acc[off:off + 8, :]
    out_ref[...] += folded


def nmse_loss(yp, yt, var, *, target_block_bytes=4 << 20):
    """Pallas implementation of NMSELoss.forward: mean(((yp - yt)**2) / var)."""
    assert yp.shape == yt.shape and yp.ndim == 2
    N, D = yp.shape
    itemsize = jnp.dtype(yp.dtype).itemsize

    var = jnp.asarray(var, dtype=jnp.float32)
    if var.ndim == 0:
        var = jnp.broadcast_to(var, (D,))
    inv_var = (1.0 / var).reshape(D)  # exact divide done once on [D]
    # TODO(synk): var == 0 yields inf/NaN, matching the PyTorch reference.

    # ---- lane-dense [R, W] view (W a multiple of 128) -----------------------
    if LANE % D == 0:
        W, rpack, pad_lanes = LANE, LANE // D, 0
        inv_row = jnp.tile(inv_var, rpack).reshape(1, W)
        yp_v, yt_v = yp, yt
    elif D % LANE == 0:
        W, rpack, pad_lanes = D, 1, 0
        inv_row = inv_var.reshape(1, W)
        yp_v, yt_v = yp, yt
    else:
        # Fallback: pad the feature axis (materializes a copy; rare shapes).
        W = _round_up(D, LANE)
        rpack, pad_lanes = 1, W - D
        inv_row = jnp.pad(inv_var, (0, pad_lanes)).reshape(1, W)
        yp_v = jnp.pad(yp, ((0, 0), (0, pad_lanes)))
        yt_v = jnp.pad(yt, ((0, 0), (0, pad_lanes)))

    R_full = N // rpack                      # complete 128-wide VMEM rows
    pack = max(1, 4 // itemsize)             # sublane packing (bf16=2, int8=4)
    row_align = 8 * pack

    tile_target = max(row_align,
                      (target_block_bytes // (W * itemsize)) // row_align * row_align)
    tile_rows = min(tile_target, R_full // row_align * row_align)

    ncores = _num_tensorcores()
    if tile_rows > 0:
        G = 2 if (ncores >= 2 and R_full >= 2 * tile_rows) else 1
        K = R_full // (G * tile_rows)
    else:
        G, K = 1, 0
    R_bulk = G * K * tile_rows               # VMEM rows the kernel consumes
    N_bulk = R_bulk * rpack                  # original rows the kernel consumes

    bulk_sum = jnp.float32(0.0)
    if R_bulk > 0:
        if pad_lanes == 0 and N % rpack == 0:
            # Zero-copy re-view of the whole array; the grid only touches the
            # first R_bulk rows (no jnp.pad, no prefix-slice copy).
            yp2 = yp_v.reshape(N // rpack, W)
            yt2 = yt_v.reshape(N // rpack, W)
        elif pad_lanes == 0:
            yp2 = yp_v[:N_bulk].reshape(R_bulk, W)
            yt2 = yt_v[:N_bulk].reshape(R_bulk, W)
        else:
            yp2 = yp_v.reshape(N, W)
            yt2 = yt_v.reshape(N, W)

        block_bytes = tile_rows * W * itemsize
        vmem_limit = int(min(48 << 20, max(16 << 20, 4 * block_bytes + (2 << 20))))

        partials = pl.pallas_call(
            functools.partial(_nmse_kernel, chunk=row_align),
            out_shape=jax.ShapeDtypeStruct((8 * G, W), jnp.float32),
            grid_spec=pltpu.PrefetchScalarGridSpec(
                num_scalar_prefetch=0,
                grid=(G, K),
                in_specs=[
                    pl.BlockSpec((tile_rows, W), lambda g, k: (g * K + k, 0)),
                    pl.BlockSpec((tile_rows, W), lambda g, k: (g * K + k, 0)),
                ],
                out_specs=pl.BlockSpec((8, W), lambda g, k: (g, 0)),
            ),
            compiler_params=pltpu.CompilerParams(
                dimension_semantics=("parallel", "arbitrary"),
                vmem_limit_bytes=vmem_limit,
            ),
        )(yp2, yt2)

        # Apply 1/var once on the tiny (8*G, W) partial sums.
        bulk_sum = jnp.sum(partials * inv_row)

    # Ragged tail (< one tile group of rows) handled in plain JAX.
    if N_bulk < N:
        tp = yp[N_bulk:].astype(jnp.float32)
        tt = yt[N_bulk:].astype(jnp.float32)
        tail_sum = jnp.sum(((tp - tt) ** 2) * inv_var[None, :])
    else:
        tail_sum = jnp.float32(0.0)

    return (bulk_sum + tail_sum) * (1.0 / (N * D))


if __name__ == "__main__":
    key = jax.random.PRNGKey(0)
    k1, k2 = jax.random.split(key)

    N, D = 256, 32
    yp = jax.random.normal(k1, (N, D), dtype=jnp.float32)
    yt = jax.random.normal(k2, (N, D), dtype=jnp.float32)
    # Deterministic "parameter" from __init__: per-feature variance (positive).
    var = jnp.linspace(0.5, 2.0, D, dtype=jnp.float32)

    loss = jax.block_until_ready(nmse_loss(yp, yt, var))

    # Pure-JAX reference check.
    ref = jnp.mean(((yp - yt) ** 2) / var.reshape(1, D))
    assert jnp.allclose(loss, ref, rtol=1e-5, atol=1e-6), (loss, ref)

    print("KERNEL_OK")
</pallas_src>

<mosaic_0001>
module attributes {stable_mosaic.version = 11 : i64} {
  func.func @_nmse_kernel(%arg0: i32, %arg1: i32, %arg2: memref<64x128xf32, #tpu.memory_space<vmem>>, %arg3: memref<64x128xf32, #tpu.memory_space<vmem>>, %arg4: memref<8x128xf32, #tpu.memory_space<vmem>>) attributes {dimension_semantics = [#tpu.dimension_semantics<parallel>, #tpu.dimension_semantics<arbitrary>], iteration_bounds = array<i64: 1, 1>, scalar_prefetch = 0 : i64, scratch_operands = 0 : i64, tpu.core_type = #tpu.core_type<tc>, window_params = [{transform_indices = @transform_0, window_bounds = array<i64: 64, 128>}, {transform_indices = @transform_1, window_bounds = array<i64: 64, 128>}, {transform_indices = @transform_2, window_bounds = array<i64: 8, 128>}]} {
    %c0_i32 = arith.constant 0 : i32
    %0 = arith.cmpi eq, %arg1, %c0_i32 : i32
    %1 = arith.extui %0 : i1 to i32
    %c0_i32_0 = arith.constant 0 : i32
    %2 = arith.cmpi ne, %1, %c0_i32_0 : i32
    scf.if %2 {
      %cst_29 = arith.constant 0.000000e+00 : f32
      %79 = vector.broadcast %cst_29 : f32 to vector<8x128xf32>
      %c0_30 = arith.constant 0 : index
      %c0_31 = arith.constant 0 : index
      %80 = vector.load %arg4[%c0_30, %c0_31] : memref<8x128xf32, #tpu.memory_space<vmem>>, vector<8x128xf32>
      tpu.vector_store %arg4[%c0_30, %c0_31], %79 {strides = array<i32>} : memref<8x128xf32, #tpu.memory_space<vmem>>, vector<8x128xf32>,
    } else {
    }
    %cst = arith.constant 0.000000e+00 : f32
    %3 = vector.broadcast %cst : f32 to vector<8x128xf32>
    %c0_i32_1 = arith.constant 0 : i32
    %c8_i32 = arith.constant 8 : i32
    %4 = arith.muli %c0_i32_1, %c8_i32 : i32
    %5 = tpu.assume_multiple %4, 8 : i32
    %6 = arith.index_cast %5 : i32 to index
    %c0 = arith.constant 0 : index
    %7 = vector.load %arg2[%6, %c0] : memref<64x128xf32, #tpu.memory_space<vmem>>, vector<8x128xf32>
    %8 = arith.index_cast %5 : i32 to index
    %c0_2 = arith.constant 0 : index
    %9 = vector.load %arg3[%8, %c0_2] : memref<64x128xf32, #tpu.memory_space<vmem>>, vector<8x128xf32>
    %10 = arith.subf %7, %9 : vector<8x128xf32>
    %11 = arith.mulf %10, %10 : vector<8x128xf32>
    %12 = arith.addf %3, %11 : vector<8x128xf32>
    %c1_i32 = arith.constant 1 : i32
    %c8_i32_3 = arith.constant 8 : i32
    %13 = arith.muli %c1_i32, %c8_i32_3 : i32
    %14 = tpu.assume_multiple %13, 8 : i32
    %15 = arith.index_cast %14 : i32 to index
    %c0_4 = arith.constant 0 : index
    %16 = vector.load %arg2[%15, %c0_4] : memref<64x128xf32, #tpu.memory_space<vmem>>, vector<8x128xf32>
    %17 = arith.index_cast %14 : i32 to index
    %c0_5 = arith.constant 0 : index
    %18 = vector.load %arg3[%17, %c0_5] : memref<64x128xf32, #tpu.memory_space<vmem>>, vector<8x128xf32>
    %19 = arith.subf %16, %18 : vector<8x128xf32>
    %20 = arith.mulf %19, %19 : vector<8x128xf32>
    %21 = arith.addf %12, %20 : vector<8x128xf32>
    %c2_i32 = arith.constant 2 : i32
    %c8_i32_6 = arith.constant 8 : i32
    %22 = arith.muli %c2_i32, %c8_i32_6 : i32
    %23 = tpu.assume_multiple %22, 8 : i32
    %24 = arith.index_cast %23 : i32 to index
    %c0_7 = arith.constant 0 : index
    %25 = vector.load %arg2[%24, %c0_7] : memref<64x128xf32, #tpu.memory_space<vmem>>, vector<8x128xf32>
    %26 = arith.index_cast %23 : i32 to index
    %c0_8 = arith.constant 0 : index
    %27 = vector.load %arg3[%26, %c0_8] : memref<64x128xf32, #tpu.memory_space<vmem>>, vector<8x128xf32>
    %28 = arith.subf %25, %27 : vector<8x128xf32>
    %29 = arith.mulf %28, %28 : vector<8x128xf32>
    %30 = arith.addf %21, %29 : vector<8x128xf32>
    %c3_i32 = arith.constant 3 : i32
    %c8_i32_9 = arith.constant 8 : i32
    %31 = arith.muli %c3_i32, %c8_i32_9 : i32
    %32 = tpu.assume_multiple %31, 8 : i32
    %33 = arith.index_cast %32 : i32 to index
    %c0_10 = arith.constant 0 : index
    %34 = vector.load %arg2[%33, %c0_10] : memref<64x128xf32, #tpu.memory_space<vmem>>, vector<8x128xf32>
    %35 = arith.index_cast %32 : i32 to index
    %c0_11 = arith.constant 0 : index
    %36 = vector.load %arg3[%35, %c0_11] : memref<64x128xf32, #tpu.memory_space<vmem>>, vector<8x128xf32>
    %37 = arith.subf %34, %36 : vector<8x128xf32>
    %38 = arith.mulf %37, %37 : vector<8x128xf32>
    %39 = arith.addf %30, %38 : vector<8x128xf32>
    %c4_i32 = arith.constant 4 : i32
    %c8_i32_12 = arith.constant 8 : i32
    %40 = arith.muli %c4_i32, %c8_i32_12 : i32
    %41 = tpu.assume_multiple %40, 8 : i32
    %42 = arith.index_cast %41 : i32 to index
    %c0_13 = arith.constant 0 : index
    %43 = vector.load %arg2[%42, %c0_13] : memref<64x128xf32, #tpu.memory_space<vmem>>, vector<8x128xf32>
    %44 = arith.index_cast %41 : i32 to index
    %c0_14 = arith.constant 0 : index
    %45 = vector.load %arg3[%44, %c0_14] : memref<64x128xf32, #tpu.memory_space<vmem>>, vector<8x128xf32>
    %46 = arith.subf %43, %45 : vector<8x128xf32>
    %47 = arith.mulf %46, %46 : vector<8x128xf32>
    %48 = arith.addf %39, %47 : vector<8x128xf32>
    %c5_i32 = arith.constant 5 : i32
    %c8_i32_15 = arith.constant 8 : i32
    %49 = arith.muli %c5_i32, %c8_i32_15 : i32
    %50 = tpu.assume_multiple %49, 8 : i32
    %51 = arith.index_cast %50 : i32 to index
    %c0_16 = arith.constant 0 : index
    %52 = vector.load %arg2[%51, %c0_16] : memref<64x128xf32, #tpu.memory_space<vmem>>, vector<8x128xf32>
    %53 = arith.index_cast %50 : i32 to index
    %c0_17 = arith.constant 0 : index
    %54 = vector.load %arg3[%53, %c0_17] : memref<64x128xf32, #tpu.memory_space<vmem>>, vector<8x128xf32>
    %55 = arith.subf %52, %54 : vector<8x128xf32>
    %56 = arith.mulf %55, %55 : vector<8x128xf32>
    %57 = arith.addf %48, %56 : vector<8x128xf32>
    %c6_i32 = arith.constant 6 : i32
    %c8_i32_18 = arith.constant 8 : i32
    %58 = arith.muli %c6_i32, %c8_i32_18 : i32
    %59 = tpu.assume_multiple %58, 8 : i32
    %60 = arith.index_cast %59 : i32 to index
    %c0_19 = arith.constant 0 : index
    %61 = vector.load %arg2[%60, %c0_19] : memref<64x128xf32, #tpu.memory_space<vmem>>, vector<8x128xf32>
    %62 = arith.index_cast %59 : i32 to index
    %c0_20 = arith.constant 0 : index
    %63 = vector.load %arg3[%62, %c0_20] : memref<64x128xf32, #tpu.memory_space<vmem>>, vector<8x128xf32>
    %64 = arith.subf %61, %63 : vector<8x128xf32>
    %65 = arith.mulf %64, %64 : vector<8x128xf32>
    %66 = arith.addf %57, %65 : vector<8x128xf32>
    %c7_i32 = arith.constant 7 : i32
    %c8_i32_21 = arith.constant 8 : i32
    %67 = arith.muli %c7_i32, %c8_i32_21 : i32
    %68 = tpu.assume_multiple %67, 8 : i32
    %69 = arith.index_cast %68 : i32 to index
    %c0_22 = arith.constant 0 : index
    %70 = vector.load %arg2[%69, %c0_22] : memref<64x128xf32, #tpu.memory_space<vmem>>, vector<8x128xf32>
    %71 = arith.index_cast %68 : i32 to index
    %c0_23 = arith.constant 0 : index
    %72 = vector.load %arg3[%71, %c0_23] : memref<64x128xf32, #tpu.memory_space<vmem>>, vector<8x128xf32>
    %73 = arith.subf %70, %72 : vector<8x128xf32>
    %74 = arith.mulf %73, %73 : vector<8x128xf32>
    %75 = arith.addf %66, %74 : vector<8x128xf32>
    %c8_i32_24 = arith.constant 8 : i32
    %c0_25 = arith.constant 0 : index
    %c0_26 = arith.constant 0 : index
    %76 = vector.load %arg4[%c0_25, %c0_26] : memref<8x128xf32, #tpu.memory_space<vmem>>, vector<8x128xf32>
    %77 = arith.addf %76, %75 : vector<8x128xf32>
    %c0_27 = arith.constant 0 : index
    %c0_28 = arith.constant 0 : index
    %78 = vector.load %arg4[%c0_27, %c0_28] : memref<8x128xf32, #tpu.memory_space<vmem>>, vector<8x128xf32>
    tpu.vector_store %arg4[%c0_27, %c0_28], %77 {strides = array<i32>} : memref<8x128xf32, #tpu.memory_space<vmem>>, vector<8x128xf32>,
    return
  }
  func.func @transform_0(%arg0: i32, %arg1: i32) -> (i32, i32) {
    %c1_i32 = arith.constant 1 : i32
    %0 = arith.muli %arg0, %c1_i32 : i32
    %1 = arith.addi %0, %arg1 : i32
    %c0_i32 = arith.constant 0 : i32
    %c0_i32_0 = arith.constant 0 : i32
    return %1, %c0_i32 : i32, i32
  }
  func.func @transform_1(%arg0: i32, %arg1: i32) -> (i32, i32) {
    %c1_i32 = arith.constant 1 : i32
    %0 = arith.muli %arg0, %c1_i32 : i32
    %1 = arith.addi %0, %arg1 : i32
    %c0_i32 = arith.constant 0 : i32
    %c0_i32_0 = arith.constant 0 : i32
    return %1, %c0_i32 : i32, i32
  }
  func.func @transform_2(%arg0: i32, %arg1: i32) -> (i32, i32) {
    %c0_i32 = arith.constant 0 : i32
    %c0_i32_0 = arith.constant 0 : i32
    return %arg0, %c0_i32 : i32, i32
  }
}

</mosaic_0001>

<bundles_post_ra>
// kernel: tpu_custom_call.1
= control target key start
LH: loop header
LB: loop body
LE: loop exit
PB: predicated region body
PF: predicated region fallthrough
CT: control target
= control target key end

     0   :  { %7 = vsyncpa [#allocation3], 0  ;;  %s264_s0 = inlined_call_operand.hbm [shape: f32[64,128], index: 0, kind: input, shape index: {}]   ;;  %s265_s1 = inlined_call_operand.hbm [shape: f32[64,128], index: 1, kind: input, shape index: {}]   ;;  %s266_s2 = inlined_call_operand.hbm [shape: f32[8,128], index: 2, kind: output, shape index: {}]  }
   0x1   :  { %8 = vsyncpa [#allocation6], 0 }
   0x2   :  { %9 = vsyncpa [#allocation4], 0  ;;  %s208_s9 = smov [#allocation2]   ;;  %s136_s13 = scalar_lea.hbm %s264_s0, 1024 }
   0x3   :  { %s19_s10 = sshll.u32 %s208_s9, 4  ;;  %p137_p0 = scmp.ne.s32.totalorder %s264_s0, %s136_s13  ;;  %s20_s10 = int_to_ptr.vmem [resolvable:$true] %s19_s10 }
   0x4   :  { %p140_p1 = scmp.lt.u32.totalorder %s136_s13, %s264_s0 }
   0x6   :  { %p142_p2 = pnand %p140_p1, %p137_p0 }
   0x8   :  { %145 = shalt.err (!%p142_p2)
}
   0x9   :  { %s146_s18 = scalar_lea.vmem %s20_s10, 1024  ;;  %p151_p4 = scmp.lt.s32.totalorder %s20_s10, %s20_s10 }
   0xa   :  { %p147_p3 = scmp.ne.s32.totalorder %s20_s10, %s146_s18  ;;  %p152_p5 = scmp.lt.s32.totalorder %s146_s18, %s146_s18 }
   0xc   :  { %p153_p6 = por %p152_p5, %p151_p4 }
   0xe   :  { %p154_p7 = pnand %p153_p6, %p147_p3 }
  0x10   :  { %157 = shalt.err (!%p154_p7)
}
  0x11   :  { %s209_s19 = smov 128   ;;  %s210_s20 = smov 8  }
  0x12   :  { %25 = dma.hbm_to_vmem [thread:$0]  %s264_s0, 1024, %s20_s10, [#allocation3], %s209_s19, %s209_s19, %s210_s20  }
  0x13   :  { %s211_s23 = smov [#allocation5]   ;;  %s158_s27 = scalar_lea.hbm %s265_s1, 1024 }
  0x14   :  { %s35_s24 = sshll.u32 %s211_s23, 4  ;;  %p159_p8 = scmp.ne.s32.totalorder %s265_s1, %s158_s27  ;;  %s36_s24 = int_to_ptr.vmem [resolvable:$true] %s35_s24 }
  0x15   :  { %p162_p9 = scmp.lt.u32.totalorder %s158_s27, %s265_s1 }
  0x17   :  { %p164_p10 = pnand %p162_p9, %p159_p8 }
  0x19   :  { %167 = shalt.err (!%p164_p10)
}
  0x1a   :  { %s168_s4 = scalar_lea.vmem %s36_s24, 1024  ;;  %p173_p12 = scmp.lt.s32.totalorder %s36_s24, %s36_s24 }
  0x1b   :  { %p169_p11 = scmp.ne.s32.totalorder %s36_s24, %s168_s4  ;;  %p174_p13 = scmp.lt.s32.totalorder %s168_s4, %s168_s4 }
  0x1d   :  { %p175_p0 = por %p174_p13, %p173_p12 }
  0x1f   :  { %p176_p1 = pnand %p175_p0, %p169_p11 }
  0x21   :  { %179 = shalt.err (!%p176_p1)
}
  0x22   :  { %41 = dma.hbm_to_vmem [thread:$0]  %s265_s1, 1024, %s36_s24, [#allocation6], %s209_s19, %s209_s19, %s210_s20  }
  0x23   :  { %202 = dma.done.wait [#allocation3], 1024  }
  0x24   :  { %203 = vsyncadd [#allocation3], 4294966272 }
  0x25   :  { %204 = dma.done.wait [#allocation6], 1024  }
  0x26   :  { %205 = vsyncadd [#allocation6], 4294966272  ;;  %v57_v0 = vld [vmem:[#allocation2] sm:$0xff]  ;;  %v63_v2 = vld [vmem:[#allocation2 + $0x8] sm:$0xff]  ;;  %s212_s1 = smov [#allocation7]  }
  0x27   :  { %v58_v1 = vld [vmem:[#allocation5] sm:$0xff]  ;;  %v65_v4 = vld [vmem:[#allocation5 + $0x8] sm:$0xff]  ;;  %v70_v5 = vld [vmem:[#allocation2 + $0x10] sm:$0xff]  ;;  %s120_s6 = sshll.u32 %s212_s1, 4  ;;  %s121_s6 = int_to_ptr.vmem [resolvable:$true] %s120_s6 }
  0x28   :  { %v59_v3 = vsub.f32 %v57_v0, %v58_v1  ;;  %v72_v6 = vld [vmem:[#allocation5 + $0x10] sm:$0xff]  ;;  %v66_v7 = vsub.f32 %v63_v2, %v65_v4  ;;  %v77_v9 = vld [vmem:[#allocation2 + $0x18] sm:$0xff]  ;;  %v84_v11 = vld [vmem:[#allocation2 + $0x20] sm:$0xff]  ;;  %s180_s7 = scalar_lea.vmem %s121_s6, 128  ;;  %p185_p3 = scmp.lt.s32.totalorder %s121_s6, %s121_s6 }
  0x29   :  { %v73_v8 = vsub.f32 %v70_v5, %v72_v6  ;;  %v79_v10 = vld [vmem:[#allocation5 + $0x18] sm:$0xff]  ;;  %v86_v14 = vld [vmem:[#allocation5 + $0x20] sm:$0xff]  ;;  %v91_v15 = vld [vmem:[#allocation2 + $0x28] sm:$0xff]  ;;  %p181_p2 = scmp.ne.s32.totalorder %s121_s6, %s180_s7  ;;  %p186_p4 = scmp.lt.s32.totalorder %s180_s7, %s180_s7 }
  0x2a   :  { %v60_v12 = vmul.f32 %v59_v3, %v59_v3  ;;  %v80_v13 = vsub.f32 %v77_v9, %v79_v10  ;;  %v93_v16 = vld [vmem:[#allocation5 + $0x28] sm:$0xff]  ;;  %v67_v17 = vmul.f32 %v66_v7, %v66_v7  ;;  %v87_v19 = vsub.f32 %v84_v11, %v86_v14  ;;  %v98_v20 = vld [vmem:[#allocation2 + $0x30] sm:$0xff]  ;;  %v105_v25 = vld [vmem:[#allocation2 + $0x38] sm:$0xff] }
  0x2b   :  { %v74_v18 = vmul.f32 %v73_v8, %v73_v8  ;;  %v100_v21 = vld [vmem:[#allocation5 + $0x30] sm:$0xff]  ;;  %v94_v24 = vsub.f32 %v91_v15, %v93_v16  ;;  %v107_v26 = vld [vmem:[#allocation5 + $0x38] sm:$0xff]  ;;  %p187_p5 = por %p186_p4, %p185_p3 }
  0x2c   :  { %v68_v22 = vadd.f32 %v67_v17, %v60_v12  ;;  %v81_v23 = vmul.f32 %v80_v13, %v80_v13  ;;  %v88_v28 = vmul.f32 %v87_v19, %v87_v19  ;;  %v101_v29 = vsub.f32 %v98_v20, %v100_v21 }
  0x2d   :  { %v95_v31 = vmul.f32 %v94_v24, %v94_v24  ;;  %v108_v32 = vsub.f32 %v105_v25, %v107_v26  ;;  %p188_p6 = pnand %p187_p5, %p181_p2 }
  0x2e   :  { %v75_v27 = vadd.f32 %v74_v18, %v68_v22  ;;  %v102_v34 = vmul.f32 %v101_v29, %v101_v29 }
  0x2f   :  { %v109_v36 = vmul.f32 %v108_v32, %v108_v32 }
  0x30   :  { %v82_v30 = vadd.f32 %v81_v23, %v75_v27 }
  0x32   :  { %v89_v33 = vadd.f32 %v88_v28, %v82_v30 }
  0x34   :  { %v96_v35 = vadd.f32 %v95_v31, %v89_v33 }
  0x36   :  { %v103_v37 = vadd.f32 %v102_v34, %v96_v35 }
  0x38   :  { %v110_v38 = vadd.f32 %v109_v36, %v103_v37 }
  0x3a   :  { %113 = vst [vmem:[#allocation7] sm:$0xff] %v110_v38 }
  0x3b   :  { %191 = shalt.err (!%p188_p6)
}
  0x3c   :  { %s192_s10 = scalar_lea.hbm %s266_s2, 128 }
  0x3d   :  { %p193_p7 = scmp.ne.s32.totalorder %s266_s2, %s192_s10  ;;  %p196_p8 = scmp.lt.u32.totalorder %s192_s10, %s266_s2 }
  0x3f   :  { %p198_p9 = pnand %p196_p8, %p193_p7 }
  0x41   :  { %201 = shalt.err (!%p198_p9)
}
  0x42   :  { %123 = dma.vmem_to_hbm [thread:$0]  %s121_s6, 128, %s266_s2, [#allocation4]  }
  0x43   :  { %206 = dma.done.wait [#allocation4], 128  }
  0x44   :  { %207 = vsyncadd [#allocation4], 4294967168 }
  0x45   :  { %127 = vsyncpa [#allocation3], 1 }
  0x46   :  { %128 = vsyncpa [#allocation6], 1 }
  0x47   :  { %129 = vsyncpa [#allocation4], 1 }

</bundles_post_ra>
